<compile_context>
chip_gen: v7x
topology: tpu7x:2x2x1
jax: 0.10.0
libtpu: 0.0.40
codegen_flags: <defaults>
</compile_context>

<pallas_src>
import jax
import jax.numpy as jnp
from jax.experimental import pallas as pl
from jax.experimental.pallas import tpu as pltpu

H1, H2 = 32, 16  # hidden widths of the DQN MLP


def _round_up(n, m):
    return ((n + m - 1) // m) * m


def _slab_layout(input_dim, out_dim):
    """Row offsets of each section inside the packed (rows, 128) param slab."""
    o_w1 = 0
    o_b1 = _round_up(o_w1 + H1, 8)       # w1^T: (H1, input_dim)
    o_w2 = _round_up(o_b1 + H1, 8)       # b1  : (H1, 1)
    o_b2 = _round_up(o_w2 + H2, 8)       # w2^T: (H2, H1)
    o_w3 = _round_up(o_b2 + H2, 8)       # b2  : (H2, 1)
    o_b3 = _round_up(o_w3 + H2, 8)       # w3  : (H2, out_dim)
    rows = _round_up(o_b3 + out_dim, 8)  # b3  : (out_dim, 1)
    return {"w1": o_w1, "b1": o_b1, "w2": o_w2, "b2": o_b2,
            "w3": o_w3, "b3": o_b3, "rows": rows}


def pack_params(params, input_dim, out_dim):
    """Pack all weights/biases into a single zero-padded (rows, 128) f32 slab.

    Weights are stored pre-transposed for the batch-on-lanes kernel layout.
    """
    lay = _slab_layout(input_dim, out_dim)
    slab = jnp.zeros((lay["rows"], 128), jnp.float32)
    slab = slab.at[lay["w1"]:lay["w1"] + H1, :input_dim].set(params["w1"].T)
    slab = slab.at[lay["b1"]:lay["b1"] + H1, 0:1].set(params["b1"].T)
    slab = slab.at[lay["w2"]:lay["w2"] + H2, :H1].set(params["w2"].T)
    slab = slab.at[lay["b2"]:lay["b2"] + H2, 0:1].set(params["b2"].T)
    slab = slab.at[lay["w3"]:lay["w3"] + H2, :out_dim].set(params["w3"])
    slab = slab.at[lay["b3"]:lay["b3"] + out_dim, 0:1].set(params["b3"].T)
    return slab


def _make_dqn_kernel(input_dim, out_dim):
    lay = _slab_layout(input_dim, out_dim)
    o_w1, o_b1 = lay["w1"], lay["b1"]
    o_w2, o_b2 = lay["w2"], lay["b2"]
    o_w3, o_b3 = lay["w3"], lay["b3"]

    def kernel(x_ref, p_ref, out_ref):
        x = x_ref[...]                                        # (Bt, input_dim)

        # fc1 + ReLU (MXU), transposed domain: h1^T = W1 @ x^T -> (H1, Bt)
        w1t = p_ref[o_w1:o_w1 + H1, :input_dim]               # (H1, input_dim)
        b1 = p_ref[o_b1:o_b1 + H1, 0:1]                       # (H1, 1)
        h1t = jnp.maximum(
            jax.lax.dot_general(w1t, x, (((1,), (1,)), ((), ())),
                                preferred_element_type=jnp.float32) + b1, 0.0)

        # fc2 + ReLU (MXU): h2^T = W2 @ h1^T -> (H2, Bt)
        w2t = p_ref[o_w2:o_w2 + H2, :H1]                      # (H2, H1)
        b2 = p_ref[o_b2:o_b2 + H2, 0:1]                       # (H2, 1)
        h2t = jnp.maximum(
            jnp.dot(w2t, h1t, preferred_element_type=jnp.float32) + b2, 0.0)

        # fc3: K=16, N=out_dim.
        w3 = p_ref[o_w3:o_w3 + H2, :out_dim]                  # (H2, out_dim)
        b3 = p_ref[o_b3:o_b3 + out_dim, 0:1]                  # (out_dim, 1)
        if out_dim == 1:
            # Broadcast-mul + 16-sublane reduce (VPU+XLU); cheaper than an MXU
            # pass producing one useful output row.
            logits = jnp.sum(h2t * w3, axis=0, keepdims=True) + b3  # (1, Bt)
        else:
            logits = jax.lax.dot_general(
                w3, h2t, (((0,), (0,)), ((), ())),
                preferred_element_type=jnp.float32) + b3      # (out_dim, Bt)

        # sigmoid(z) = 0.5 * tanh(z / 2) + 0.5 — single EUP push, full f32
        # precision, no Newton-refined reciprocal.
        out_ref[...] = 0.5 * jnp.tanh(0.5 * logits) + 0.5

    return kernel


def dqn_forward(x, params_slab, input_dim, out_dim, *, block_b=8192):
    """x: (batch, input_dim) f32. params_slab: packed (rows, 128) f32 slab.

    Returns (batch, out_dim) f32. Internally the kernel writes the lane-dense
    transposed output (out_dim, batch); the wrapper transposes it back.
    """
    batch = x.shape[0]
    kernel = _make_dqn_kernel(input_dim, out_dim)
    out_shape = jax.ShapeDtypeStruct((out_dim, batch), jnp.float32)
    vmem = pl.BlockSpec(memory_space=pltpu.MemorySpace.VMEM)

    if batch <= block_b:
        # Small batch: no grid, no pipelining scaffolding — single shot with
        # all operands resident in VMEM (latency-optimized).
        out_t = pl.pallas_call(
            kernel,
            out_shape=out_shape,
            in_specs=[vmem, vmem],
            out_specs=vmem,
        )(x, params_slab)
        return out_t.T

    # Large batch: tile the batch axis.
    #  * Even step count so v7x's 2 TensorCores both get work ("parallel").
    #  * Param slab index_map is batch-independent -> stays VMEM-resident.
    #  * vmem_limit_bytes keeps the double-buffered x tile + activations safe
    #    on v7x (64 MiB physical) and above v5e's 16 MiB scoped default.
    steps = pl.cdiv(batch, block_b)
    if steps % 2:
        steps += 1
    bb = _round_up(pl.cdiv(batch, steps), 128)   # lane-dense output block
    steps = pl.cdiv(batch, bb)

    out_t = pl.pallas_call(
        kernel,
        out_shape=out_shape,
        grid=(steps,),
        in_specs=[
            pl.BlockSpec((bb, input_dim), lambda i: (i, 0)),
            pl.BlockSpec(params_slab.shape, lambda i: (0, 0)),
        ],
        out_specs=pl.BlockSpec((out_dim, bb), lambda i: (0, i)),
        compiler_params=pltpu.CompilerParams(
            dimension_semantics=("parallel",),
            vmem_limit_bytes=32 << 20),
    )(x, params_slab)
    return out_t.T


def init_dqn_params(key, input_dim, output_dim=1):
    """Deterministic init mirroring nn.Linear shapes (weights stored as (in, out))."""
    dims = [(input_dim, H1), (H1, H2), (H2, output_dim)]
    params = {}
    for idx, (fan_in, fan_out) in enumerate(dims, start=1):
        key, kw, kb = jax.random.split(key, 3)
        bound = 1.0 / jnp.sqrt(jnp.float32(fan_in))
        params[f"w{idx}"] = jax.random.uniform(
            kw, (fan_in, fan_out), jnp.float32, -bound, bound)
        params[f"b{idx}"] = jax.random.uniform(
            kb, (1, fan_out), jnp.float32, -bound, bound)
    return params


def dqn_reference(x, params):
    h1 = jnp.maximum(x @ params["w1"] + params["b1"], 0.0)
    h2 = jnp.maximum(h1 @ params["w2"] + params["b2"], 0.0)
    logits = h2 @ params["w3"] + params["b3"]
    return 1.0 / (1.0 + jnp.exp(-logits))


if __name__ == "__main__":
    key = jax.random.PRNGKey(0)
    key, kx = jax.random.split(key)

    batch, input_dim, output_dim = 8, 16, 1
    x = jax.random.normal(kx, (batch, input_dim), jnp.float32)
    params = init_dqn_params(key, input_dim, output_dim)
    slab = pack_params(params, input_dim, output_dim)

    # Small-batch (no-grid, latency-optimized) path.
    out = dqn_forward(x, slab, input_dim, output_dim)
    jax.block_until_ready(out)
    ref = dqn_reference(x, params)
    assert out.shape == (batch, output_dim)
    assert jnp.allclose(out, ref, atol=1e-5), "small-batch mismatch vs reference"

    # Batch-tiled path (lane-dense output, even "parallel" grid, weights
    # VMEM-resident). Small block_b here just to exercise the gridded path.
    xb = jax.random.normal(jax.random.PRNGKey(1), (512, input_dim), jnp.float32)
    outb = dqn_forward(xb, slab, input_dim, output_dim, block_b=128)
    jax.block_until_ready(outb)
    refb = dqn_reference(xb, params)
    assert outb.shape == (512, output_dim)
    assert jnp.allclose(outb, refb, atol=1e-5), "tiled-batch mismatch vs reference"

    print("KERNEL_OK")
</pallas_src>

<mosaic_0001>
module attributes {stable_mosaic.version = 11 : i64} {
  func.func @kernel(%arg0: memref<8x16xf32, #tpu.memory_space<vmem>>, %arg1: memref<120x128xf32, #tpu.memory_space<vmem>>, %arg2: memref<1x8xf32, #tpu.memory_space<vmem>>) attributes {dimension_semantics = [], scalar_prefetch = 0 : i64, scratch_operands = 0 : i64, tpu.core_type = #tpu.core_type<tc>} {
    %c0 = arith.constant 0 : index
    %c0_0 = arith.constant 0 : index
    %0 = vector.load %arg0[%c0, %c0_0] : memref<8x16xf32, #tpu.memory_space<vmem>>, vector<8x16xf32>
    %c0_1 = arith.constant 0 : index
    %c0_2 = arith.constant 0 : index
    %1 = vector.load %arg1[%c0_1, %c0_2] : memref<120x128xf32, #tpu.memory_space<vmem>>, vector<32x16xf32>
    %c32 = arith.constant 32 : index
    %c0_3 = arith.constant 0 : index
    %2 = vector.load %arg1[%c32, %c0_3] : memref<120x128xf32, #tpu.memory_space<vmem>>, vector<32x1xf32>
    %cst = arith.constant dense<0.000000e+00> : vector<32x8xf32>
    %3 = tpu.matmul %1, %0, %cst {dimension_numbers = #tpu.dot_dimension_numbers<[1], [1], [0], [0], [0, 0, 1, 0], [], []>} : vector<32x16xf32>, vector<8x16xf32>, vector<32x8xf32> -> vector<32x8xf32>
    %4 = vector.broadcast %2 : vector<32x1xf32> to vector<32x8xf32>
    %5 = arith.addf %3, %4 : vector<32x8xf32>
    %cst_4 = arith.constant 0.000000e+00 : f32
    %6 = vector.broadcast %cst_4 : f32 to vector<32x8xf32>
    %7 = arith.maximumf %5, %6 : vector<32x8xf32>
    %c64 = arith.constant 64 : index
    %c0_5 = arith.constant 0 : index
    %8 = vector.load %arg1[%c64, %c0_5] : memref<120x128xf32, #tpu.memory_space<vmem>>, vector<16x32xf32>
    %c80 = arith.constant 80 : index
    %c0_6 = arith.constant 0 : index
    %9 = vector.load %arg1[%c80, %c0_6] : memref<120x128xf32, #tpu.memory_space<vmem>>, vector<16x1xf32>
    %cst_7 = arith.constant dense<0.000000e+00> : vector<16x8xf32>
    %10 = tpu.matmul %8, %7, %cst_7 {dimension_numbers = #tpu.dot_dimension_numbers<[1], [0], [0], [1], [0, 0, 1, 1], [], []>} : vector<16x32xf32>, vector<32x8xf32>, vector<16x8xf32> -> vector<16x8xf32>
    %11 = vector.broadcast %9 : vector<16x1xf32> to vector<16x8xf32>
    %12 = arith.addf %10, %11 : vector<16x8xf32>
    %cst_8 = arith.constant 0.000000e+00 : f32
    %13 = vector.broadcast %cst_8 : f32 to vector<16x8xf32>
    %14 = arith.maximumf %12, %13 : vector<16x8xf32>
    %c96 = arith.constant 96 : index
    %c0_9 = arith.constant 0 : index
    %15 = vector.load %arg1[%c96, %c0_9] : memref<120x128xf32, #tpu.memory_space<vmem>>, vector<16x1xf32>
    %c112 = arith.constant 112 : index
    %c0_10 = arith.constant 0 : index
    %16 = vector.load %arg1[%c112, %c0_10] : memref<120x128xf32, #tpu.memory_space<vmem>>, vector<1x1xf32>
    %17 = vector.broadcast %15 : vector<16x1xf32> to vector<16x8xf32>
    %18 = arith.mulf %14, %17 : vector<16x8xf32>
    %cst_11 = arith.constant dense<0.000000e+00> : vector<8xf32>
    %19 = vector.multi_reduction <add>, %18, %cst_11 [0] : vector<16x8xf32> to vector<8xf32>
    %20 = vector.shape_cast %19 : vector<8xf32> to vector<1x8xf32>
    %21 = vector.broadcast %16 : vector<1x1xf32> to vector<1x8xf32>
    %22 = arith.addf %20, %21 : vector<1x8xf32>
    %cst_12 = arith.constant 5.000000e-01 : f32
    %23 = vector.broadcast %cst_12 : f32 to vector<1x8xf32>
    %24 = arith.mulf %23, %22 : vector<1x8xf32>
    %25 = math.tanh %24 : vector<1x8xf32>
    %cst_13 = arith.constant 5.000000e-01 : f32
    %26 = vector.broadcast %cst_13 : f32 to vector<1x8xf32>
    %27 = arith.mulf %26, %25 : vector<1x8xf32>
    %cst_14 = arith.constant 5.000000e-01 : f32
    %28 = vector.broadcast %cst_14 : f32 to vector<1x8xf32>
    %29 = arith.addf %27, %28 : vector<1x8xf32>
    %c0_15 = arith.constant 0 : index
    %c0_16 = arith.constant 0 : index
    %30 = vector.load %arg2[%c0_15, %c0_16] : memref<1x8xf32, #tpu.memory_space<vmem>>, vector<1x8xf32>
    tpu.vector_store %arg2[%c0_15, %c0_16], %29 {strides = array<i32>} : memref<1x8xf32, #tpu.memory_space<vmem>>, vector<1x8xf32>,
    return
  }
}

</mosaic_0001>

<bundles_post_ra>
// kernel: tpu_custom_call.1
= control target key start
LH: loop header
LB: loop body
LE: loop exit
PB: predicated region body
PF: predicated region fallthrough
CT: control target
= control target key end

     0   :  { %7 = vsyncpa [#allocation3], 0  ;;  %s522_s0 = inlined_call_operand.hbm [shape: f32[8,16], index: 0, kind: input, shape index: {}]   ;;  %s523_s1 = inlined_call_operand.hbm [shape: f32[120,128], index: 1, kind: input, shape index: {}]   ;;  %s524_s2 = inlined_call_operand.hbm [shape: f32[1,8], index: 2, kind: output, shape index: {}]  }
   0x1   :  { %8 = vsyncpa [#allocation6], 0 }
   0x2   :  { %9 = vsyncpa [#allocation4], 0  ;;  %s450_s9 = smov [#allocation2]   ;;  %s451_s11 = smov [#allocation5]  }
   0x3   :  { %s16_s10 = sshll.u32 %s450_s9, 4  ;;  %s25_s12 = sshll.u32 %s451_s11, 4  ;;  %s17_s10 = int_to_ptr.vmem [resolvable:$true] %s16_s10  ;;  %s471_s12 = int_to_ptr.vmem [resolvable:$true] %s25_s12 }
   0x4   :  { %s378_s15 = scalar_lea.hbm %s522_s0, 128 }
   0x5   :  { %p379_p0 = scmp.ne.s32.totalorder %s522_s0, %s378_s15  ;;  %p382_p1 = scmp.lt.u32.totalorder %s378_s15, %s522_s0 }
   0x7   :  { %p384_p2 = pnand %p382_p1, %p379_p0 }
   0x9   :  { %387 = shalt.err (!%p384_p2)
}
   0xa   :  { %s388_s20 = scalar_lea.vmem %s17_s10, 128  ;;  %p393_p4 = scmp.lt.s32.totalorder %s17_s10, %s17_s10 }
   0xb   :  { %p389_p3 = scmp.ne.s32.totalorder %s17_s10, %s388_s20  ;;  %p394_p5 = scmp.lt.s32.totalorder %s388_s20, %s388_s20 }
   0xd   :  { %p395_p6 = por %p394_p5, %p393_p4 }
   0xf   :  { %p396_p7 = pnand %p395_p6, %p389_p3 }
  0x11   :  { %399 = shalt.err (!%p396_p7)
}
  0x12   :  { %19 = dma.hbm_to_vmem [thread:$0]  %s522_s0, 128, %s17_s10, [#allocation3]  }
  0x13   :  { %s400_s25 = scalar_lea.hbm %s523_s1, 1920 }
  0x14   :  { %p401_p8 = scmp.ne.s32.totalorder %s523_s1, %s400_s25  ;;  %p404_p9 = scmp.lt.u32.totalorder %s400_s25, %s523_s1 }
  0x16   :  { %p406_p10 = pnand %p404_p9, %p401_p8 }
  0x18   :  { %409 = shalt.err (!%p406_p10)
}
  0x19   :  { %s410_s30 = scalar_lea.vmem %s471_s12, 1920  ;;  %p415_p12 = scmp.lt.s32.totalorder %s471_s12, %s471_s12 }
  0x1a   :  { %p411_p11 = scmp.ne.s32.totalorder %s471_s12, %s410_s30  ;;  %p416_p13 = scmp.lt.s32.totalorder %s410_s30, %s410_s30 }
  0x1c   :  { %p417_p0 = por %p416_p13, %p415_p12 }
  0x1e   :  { %p418_p1 = pnand %p417_p0, %p411_p11 }
  0x20   :  { %421 = shalt.err (!%p418_p1)
}
  0x21   :  { %s452_s0 = smov 128   ;;  %s453_s3 = smov 8  }
  0x22   :  { %31 = dma.hbm_to_vmem [thread:$0]  %s523_s1, 1920, %s471_s12, [#allocation6], %s452_s0, %s452_s0, %s453_s3  }
  0x23   :  { %444 = dma.done.wait [#allocation3], 128  }
  0x24   :  { %445 = vsyncadd [#allocation3], 4294967168 }
  0x25   :  { %446 = dma.done.wait [#allocation6], 1920  }
  0x26   :  { %447 = vsyncadd [#allocation6], 4294965376  ;;  %v454_v0 = vmov 0   ;;  %vm67_vm0 = vcmask 130048   ;;  %v38_v1 = vld [vmem:[#allocation2] sm:$0xff]  ;;  %v39_v2 = vld [vmem:[#allocation5] sm:$0xff] }
  0x27   :  { %374 = vset.pattern.permute.xlu0 %v454_v0  ;;  %375 = vset.pattern.permute.xlu1 %v454_v0  ;;  %v43_v3 = vld [vmem:[#allocation5 + $0x20] sm:$0xff]  ;;  %v40_v4 = vld [vmem:[#allocation5 + $0x8] sm:$0xff]  ;;  %v45_v5 = vld [vmem:[#allocation5 + $0x30] sm:$0xff]  ;;  %vm186_vm1 = vcmask 261120   ;;  %vm285_vm2 = vcmask 64512   ;;  %s455_s1 = smov [#allocation7]  }
  0x28   :  { %341 = vmatprep.subr.msk.mxu0 %vm67_vm0, %v38_v1  ;;  %343 = vmatprep.mubr.msk.f32.mxu0 %vm67_vm0, %v39_v2  ;;  %v41_v6 = vld [vmem:[#allocation5 + $0x10] sm:$0xff]  ;;  %v44_v7 = vld [vmem:[#allocation5 + $0x28] sm:$0xff]  ;;  %v46_v8 = vld [vmem:[#allocation5 + $0x38] sm:$0xff]  ;;  %s313_s6 = sshll.u32 %s455_s1, 4  ;;  %vm305_vm3 = vcmask 57344   ;;  %s314_s6 = int_to_ptr.vmem [resolvable:$true] %s313_s6 }
  0x29   :  { %342 = vmatpush3.xpose.msk.msra.mxu0 %vm67_vm0, %v38_v1  ;;  %49 = vperm.xlu0 %374, %v43_v3   ;;  %v42_v9 = vld [vmem:[#allocation5 + $0x18] sm:$0xff]  ;;  %v174_v10 = vld [vmem:[#allocation5 + $0x50] sm:$0xff]  ;;  %v270_v12 = vld [vmem:[#allocation5 + $0x60] sm:$0xff]  ;;  %s422_s7 = scalar_lea.vmem %s314_s6, 16  ;;  %s426_s8 = scalar_lea.vmem %s314_s6, 32 }
  0x2a   :  { %59 = vperm.xlu1 %375, %v45_v5   ;;  %v175_v11 = vld [vmem:[#allocation5 + $0x58] sm:$0xff]  ;;  %v271_v13 = vld [vmem:[#allocation5 + $0x68] sm:$0xff]  ;;  %v272_v14 = vld [vmem:[#allocation5 + $0x70] sm:$0x1]  ;;  %p423_p2 = scmp.ne.s32.totalorder %s314_s6, %s422_s7  ;;  %p427_p3 = scmp.lt.s32.totalorder %s314_s6, %s314_s6 }
  0x2b   :  { %v172_v15 = vld [vmem:[#allocation5 + $0x40] sm:$0xff]  ;;  %v173_v34 = vld [vmem:[#allocation5 + $0x48] sm:$0xff]  ;;  %p428_p4 = scmp.lt.s32.totalorder %s426_s8, %s422_s7 }
  0x2c   :  { %344 = vmatmul.mubr.msk.f32.vlgmr.msra.gmra.mrb[0].mxu0 %vm67_vm0, %v40_v4  ;;  %357 = vmatprep.mubr.msk.f32.mxu1 %vm186_vm1, %v172_v15 }
  0x2d   :  { %346 = vmatprep.mubr.msk.f32.mxu0 %vm67_vm0, %v41_v6  ;;  %54 = vperm.xlu0 %374, %v44_v7   ;;  %p429_p5 = por %p428_p4, %p427_p3 }
  0x2e   :  { %64 = vperm.xlu1 %375, %v46_v8  }
  0x2f   :  { %p430_p6 = pnand %p429_p5, %p423_p2 }
  0x30   :  { %347 = vmatmul.mubr.msk.f32.gmra.mrb[2].mxu0 %vm67_vm0, %v42_v9 }
  0x31   :  { %178 = vperm.xlu0 %374, %v174_v10  }
  0x32   :  { %183 = vperm.xlu1 %375, %v175_v11  }
  0x35   :  { %275 = vperm.xlu0 %374, %v270_v12  }
  0x36   :  { %280 = vperm.xlu1 %375, %v271_v13  }
  0x39   :  { %297 = vperm.xlu0 %374, %v272_v14  }
  0xa8   :  { %v50_v16 = vpop.permute.xlu0 %49 }
  0xa9   :  { %v60_v17 = vpop.permute.xlu1 %59 }
  0xac   :  { %v55_v18 = vpop.permute.xlu0 %54 }
  0xad   :  { %v65_v24 = vpop.permute.xlu1 %64 }
  0xb0   :  { %v179_v36 = vpop.permute.xlu0 %178 }
  0xb1   :  { %v184_v35 = vpop.permute.xlu1 %183 }
  0xb4   :  { %v276_v44 = vpop.permute.xlu0 %275 }
  0xb5   :  { %v281_v42 = vpop.permute.xlu1 %280 }
  0xb8   :  { %v298_v56 = vpop.permute.xlu0 %297 }
  0xff   :  { %v345_v19 = vpop.f32.mrb[0].mxu0 }
 0x100   :  { %v155_v20 = vadd.f32 %v345_v19, %v55_v18  ;;  %v149_v21 = vpop.f32.mrb[1].mxu0 }
 0x101   :  { %v150_v22 = vadd.f32 %v149_v21, %v50_v16 }
 0x102   :  { %v169_v23 = vmax.f32 %v155_v20, 0.0 }
 0x103   :  { %v168_v25 = vmax.f32 %v150_v22, 0.0  ;;  %v348_v26 = vpop.f32.mrb[2].mxu0 }
 0x104   :  { %v165_v27 = vadd.f32 %v348_v26, %v65_v24  ;;  %v159_v28 = vpop.f32.mrb[3].mxu0 }
 0x105   :  { %v160_v29 = vadd.f32 %v159_v28, %v60_v17  ;;  %v360_v30 = vpack.c.bf16 %v169_v23, %v168_v25 }
 0x106   :  { %v171_v31 = vmax.f32 %v165_v27, 0.0 }
 0x107   :  { %v170_v32 = vmax.f32 %v160_v29, 0.0  ;;  %361 = vmatprep.subr.bf16.mxu1 %v360_v30 }
 0x108   :  { %363 = vmatpush3.bf16.msra.mxu1 %v360_v30 }
 0x109   :  { %v364_v33 = vpack.c.bf16 %v171_v31, %v170_v32 }
 0x10b   :  { %365 = vmatprep.subr.bf16.mxu1 %v364_v33 }
 0x10c   :  { %367 = vmatpush3.bf16.msra.mxu1 %v364_v33 }
 0x10f   :  { %358 = vmatmul.mubr.msk.f32.vlgmr.msra.gmra.mrb[0].mxu1 %vm186_vm1, %v173_v34 }
 0x1e2   :  { %v359_v37 = vpop.f32.mrb[0].mxu1 }
 0x1e3   :  { %v265_v38 = vadd.f32 %v359_v37, %v184_v35  ;;  %v259_v39 = vpop.f32.mrb[1].mxu1 }
 0x1e4   :  { %v260_v40 = vadd.f32 %v259_v39, %v179_v36 }
 0x1e5   :  { %v269_v41 = vmax.f32 %v265_v38, 0.0 }
 0x1e6   :  { %v268_v43 = vmax.f32 %v260_v40, 0.0 }
 0x1e7   :  { %v284_v45 = vmul.f32 %v281_v42, %v269_v41 }
 0x1e8   :  { %v283_v46 = vmul.f32 %v276_v44, %v268_v43 }
 0x1e9   :  { %v287_v47 = vsel %vm285_vm2, %v284_v45, 0.0 }
 0x1ea   :  { %v286_v48 = vsel %vm285_vm2, %v283_v46, 0.0 }
 0x1eb   :  { %v288_v49 = vadd.f32 %v287_v47, %v286_v48 }
 0x1ed   :  { %v289_v50 = vrot.slane %v288_v49, 4 }
 0x1ef   :  { %v290_v51 = vadd.f32 %v289_v50, %v288_v49 }
 0x1f1   :  { %v291_v52 = vrot.slane %v290_v51, 2 }
 0x1f3   :  { %v292_v53 = vadd.f32 %v291_v52, %v290_v51 }
 0x1f5   :  { %v293_v54 = vrot.slane %v292_v53, 1 }
 0x1f7   :  { %v294_v55 = vadd.f32 %v293_v54, %v292_v53 }
 0x1f9   :  { %v300_v57 = vadd.f32 %v298_v56, %v294_v55 }
 0x1fb   :  { %v301_v58 = vmul.f32 0.5, %v300_v57 }
 0x1fd   :  { %376 = vtanh.f32 %v301_v58 }
 0x207   :  { %v377_v59 = vpop.eup %376 }
 0x208   :  { %v303_v60 = vmul.f32 0.5, %v377_v59 }
 0x20a   :  { %v304_v61 = vadd.f32 0.5, %v303_v60 }
 0x20c   :  { %306 = vst.msk [vmem:[#allocation7] sm:$0x1] %vm305_vm3, %v304_v61 }
 0x20d   :  { %433 = shalt.err (!%p430_p6)
}
 0x20e   :  { %s434_s11 = scalar_lea.hbm %s524_s2, 16 }
 0x20f   :  { %p435_p7 = scmp.ne.s32.totalorder %s524_s2, %s434_s11  ;;  %p438_p8 = scmp.lt.u32.totalorder %s434_s11, %s524_s2 }
 0x211   :  { %p440_p9 = pnand %p438_p8, %p435_p7 }
 0x213   :  { %443 = shalt.err (!%p440_p9)
}
 0x214   :  { %316 = dma.vmem_to_hbm [thread:$0]  %s314_s6, 16, %s524_s2, [#allocation4]  }
 0x215   :  { %448 = dma.done.wait [#allocation4], 16  }
 0x216   :  { %449 = vsyncadd [#allocation4], 4294967280 }
 0x217   :  { %320 = vsyncpa [#allocation3], 1 }
 0x218   :  { %321 = vsyncpa [#allocation6], 1 }
 0x219   :  { %322 = vsyncpa [#allocation4], 1 }

</bundles_post_ra>
